<compile_context>
chip_gen: v6e
topology: v6e:2x2x1
jax: 0.10.0
libtpu: 0.0.40
codegen_flags: <defaults>
</compile_context>

<pallas_src>
import math

import jax
import jax.numpy as jnp
from jax.experimental import pallas as pl
from jax.experimental.pallas import tpu as pltpu

HIDDEN = 20          # dense1 output width
OUT = 2              # dense2 output width
OUT_PAD = 128        # lane-dense padded output width
TILE_B_MAX = 1024    # rows per grid step (amortizes ~0.35 us/step, fits v7x VMEM easily)


def _round_up(n, m):
    return ((n + m - 1) // m) * m


def _mlp_kernel(x_ref, w1_ref, b1_ref, w2_ref, b2_ref, o_ref):
    # Two MXU matmuls + a VPU ReLU/bias-add on a fully VMEM-resident tile.
    x = x_ref[...]
    h = jnp.dot(x, w1_ref[...], preferred_element_type=jnp.float32)
    h = jnp.maximum(h + b1_ref[...], 0.0)
    y = jnp.dot(h, w2_ref[...], preferred_element_type=jnp.float32) + b2_ref[...]
    o_ref[...] = y.astype(o_ref.dtype)


def _mlp_pallas(x, w1, b1, w2, b2):
    """x: (B, F) f32 -> (B, OUT) f32 via a batch-tiled Pallas kernel."""
    B, F = x.shape

    # Zero-pad the tiny second layer to a lane-dense (20, 128) / (1, 128) so the
    # output block has a 128-wide last dim (unmasked stores). Extra MXU columns
    # are free (MXU pads N internally anyway).
    w2_p = jnp.pad(w2, ((0, 0), (0, OUT_PAD - OUT)))
    b2_p = jnp.pad(b2, ((0, 0), (0, OUT_PAD - OUT)))

    # Choose tile: large for big batches, sublane-aligned clamp for small ones.
    tile_b = min(TILE_B_MAX, _round_up(B, 8))
    b_pad = _round_up(B, tile_b)
    if b_pad != B:
        x = jnp.pad(x, ((0, b_pad - B), (0, 0)))

    grid = (b_pad // tile_b,)

    flops = 2 * b_pad * F * HIDDEN + 2 * b_pad * HIDDEN * OUT_PAD
    bytes_accessed = (
        b_pad * F * 4 + b_pad * OUT_PAD * 4
        + w1.size * 4 + b1.size * 4 + w2_p.size * 4 + b2_p.size * 4
    )

    out_padded = pl.pallas_call(
        _mlp_kernel,
        out_shape=jax.ShapeDtypeStruct((b_pad, OUT_PAD), x.dtype),
        grid_spec=pltpu.PrefetchScalarGridSpec(
            num_scalar_prefetch=0,
            grid=grid,
            in_specs=[
                pl.BlockSpec((tile_b, F), lambda i: (i, 0)),        # x: streamed per tile
                pl.BlockSpec((F, HIDDEN), lambda i: (0, 0)),        # w1: resident
                pl.BlockSpec((1, HIDDEN), lambda i: (0, 0)),        # b1: resident
                pl.BlockSpec((HIDDEN, OUT_PAD), lambda i: (0, 0)),  # w2 (padded): resident
                pl.BlockSpec((1, OUT_PAD), lambda i: (0, 0)),       # b2 (padded): resident
            ],
            out_specs=pl.BlockSpec((tile_b, OUT_PAD), lambda i: (i, 0)),
        ),
        compiler_params=pltpu.CompilerParams(
            dimension_semantics=("parallel",),      # batch axis -> both TCs on v7x
            vmem_limit_bytes=32 * 1024 * 1024,      # sized for v7x's smaller VMEM
        ),
        cost_estimate=pl.CostEstimate(
            flops=flops, transcendentals=0, bytes_accessed=bytes_accessed
        ),
    )(x, w1, b1, w2_p, b2_p)

    return out_padded[:B, :OUT]


def mlp_forward(x, w1, b1, w2, b2, *, use_pallas=None):
    """Forward pass of MyModel. Falls back to plain XLA for tiny batches unless forced."""
    B = x.shape[0]
    if use_pallas is None:
        use_pallas = B >= 512  # pallas_call fixed overhead dominates at toy sizes
    if not use_pallas:
        return jnp.maximum(x @ w1 + b1, 0.0) @ w2 + b2
    return _mlp_pallas(x, w1, b1, w2, b2)


def init_params(key, n_features, hidden=HIDDEN, out=OUT, dtype=jnp.float32):
    """Deterministic init mirroring torch.nn.Linear (uniform +/-1/sqrt(fan_in))."""
    k1, k2, k3, k4 = jax.random.split(key, 4)
    bound1 = 1.0 / math.sqrt(n_features)
    bound2 = 1.0 / math.sqrt(hidden)
    w1 = jax.random.uniform(k1, (n_features, hidden), dtype, -bound1, bound1)
    b1 = jax.random.uniform(k2, (1, hidden), dtype, -bound1, bound1)
    w2 = jax.random.uniform(k3, (hidden, out), dtype, -bound2, bound2)
    b2 = jax.random.uniform(k4, (1, out), dtype, -bound2, bound2)
    return w1, b1, w2, b2


def _reference(x, w1, b1, w2, b2):
    return jnp.maximum(x @ w1 + b1, 0.0) @ w2 + b2


if __name__ == "__main__":
    key = jax.random.PRNGKey(0)
    k_x1, k_x2, k_p = jax.random.split(key, 3)

    n_features = 32
    w1, b1, w2, b2 = init_params(k_p, n_features)

    # Small shape (matches the toy test usage): single-tile grid, exercises padding.
    x_small = jax.random.normal(k_x1, (8, n_features), jnp.float32)
    y_small = mlp_forward(x_small, w1, b1, w2, b2, use_pallas=True)
    jax.block_until_ready(y_small)
    assert y_small.shape == (8, OUT)
    assert jnp.allclose(y_small, _reference(x_small, w1, b1, w2, b2), atol=1e-5, rtol=1e-5)

    # Larger batch: exercises the multi-step batch grid + tail padding.
    x_big = jax.random.normal(k_x2, (2056, n_features), jnp.float32)
    y_big = mlp_forward(x_big, w1, b1, w2, b2, use_pallas=True)
    jax.block_until_ready(y_big)
    assert y_big.shape == (2056, OUT)
    assert jnp.allclose(y_big, _reference(x_big, w1, b1, w2, b2), atol=1e-5, rtol=1e-5)

    print("KERNEL_OK")
</pallas_src>

<mosaic_0001>
module attributes {stable_mosaic.version = 11 : i64} {
  func.func @_mlp_kernel(%arg0: i32, %arg1: memref<8x32xf32, #tpu.memory_space<vmem>>, %arg2: memref<32x20xf32, #tpu.memory_space<vmem>>, %arg3: memref<1x20xf32, #tpu.memory_space<vmem>>, %arg4: memref<20x128xf32, #tpu.memory_space<vmem>>, %arg5: memref<1x128xf32, #tpu.memory_space<vmem>>, %arg6: memref<8x128xf32, #tpu.memory_space<vmem>>) attributes {dimension_semantics = [#tpu.dimension_semantics<parallel>], iteration_bounds = array<i64: 1>, scalar_prefetch = 0 : i64, scratch_operands = 0 : i64, tpu.core_type = #tpu.core_type<tc>, window_params = [{transform_indices = @transform_0, window_bounds = array<i64: 8, 32>}, {pipeline_mode = #tpu.pipeline_mode<synchronous>, transform_indices = @transform_1, window_bounds = array<i64: 32, 20>}, {pipeline_mode = #tpu.pipeline_mode<synchronous>, transform_indices = @transform_2, window_bounds = array<i64: 1, 20>}, {pipeline_mode = #tpu.pipeline_mode<synchronous>, transform_indices = @transform_3, window_bounds = array<i64: 20, 128>}, {pipeline_mode = #tpu.pipeline_mode<synchronous>, transform_indices = @transform_4, window_bounds = array<i64: 1, 128>}, {transform_indices = @transform_5, window_bounds = array<i64: 8, 128>}]} {
    %c0 = arith.constant 0 : index
    %c0_0 = arith.constant 0 : index
    %0 = vector.load %arg1[%c0, %c0_0] : memref<8x32xf32, #tpu.memory_space<vmem>>, vector<8x32xf32>
    %c0_1 = arith.constant 0 : index
    %c0_2 = arith.constant 0 : index
    %1 = vector.load %arg2[%c0_1, %c0_2] : memref<32x20xf32, #tpu.memory_space<vmem>>, vector<32x20xf32>
    %cst = arith.constant dense<0.000000e+00> : vector<8x20xf32>
    %2 = tpu.matmul %0, %1, %cst {dimension_numbers = #tpu.dot_dimension_numbers<[1], [0], [0], [1], [0, 0, 1, 1], [], []>} : vector<8x32xf32>, vector<32x20xf32>, vector<8x20xf32> -> vector<8x20xf32>
    %c0_3 = arith.constant 0 : index
    %c0_4 = arith.constant 0 : index
    %3 = vector.load %arg3[%c0_3, %c0_4] : memref<1x20xf32, #tpu.memory_space<vmem>>, vector<1x20xf32>
    %4 = vector.broadcast %3 : vector<1x20xf32> to vector<8x20xf32>
    %5 = arith.addf %2, %4 : vector<8x20xf32>
    %cst_5 = arith.constant 0.000000e+00 : f32
    %6 = vector.broadcast %cst_5 : f32 to vector<8x20xf32>
    %7 = arith.maximumf %5, %6 : vector<8x20xf32>
    %c0_6 = arith.constant 0 : index
    %c0_7 = arith.constant 0 : index
    %8 = vector.load %arg4[%c0_6, %c0_7] : memref<20x128xf32, #tpu.memory_space<vmem>>, vector<20x128xf32>
    %cst_8 = arith.constant dense<0.000000e+00> : vector<8x128xf32>
    %9 = tpu.matmul %7, %8, %cst_8 {dimension_numbers = #tpu.dot_dimension_numbers<[1], [0], [0], [1], [0, 0, 1, 1], [], []>} : vector<8x20xf32>, vector<20x128xf32>, vector<8x128xf32> -> vector<8x128xf32>
    %c0_9 = arith.constant 0 : index
    %c0_10 = arith.constant 0 : index
    %10 = vector.load %arg5[%c0_9, %c0_10] : memref<1x128xf32, #tpu.memory_space<vmem>>, vector<1x128xf32>
    %11 = vector.broadcast %10 : vector<1x128xf32> to vector<8x128xf32>
    %12 = arith.addf %9, %11 : vector<8x128xf32>
    %c0_11 = arith.constant 0 : index
    %c0_12 = arith.constant 0 : index
    %13 = vector.load %arg6[%c0_11, %c0_12] : memref<8x128xf32, #tpu.memory_space<vmem>>, vector<8x128xf32>
    tpu.vector_store %arg6[%c0_11, %c0_12], %12 {strides = array<i32>} : memref<8x128xf32, #tpu.memory_space<vmem>>, vector<8x128xf32>,
    return
  }
  func.func @transform_0(%arg0: i32) -> (i32, i32) {
    %c0_i32 = arith.constant 0 : i32
    %c0_i32_0 = arith.constant 0 : i32
    return %arg0, %c0_i32 : i32, i32
  }
  func.func @transform_1(%arg0: i32) -> (i32, i32) {
    %c0_i32 = arith.constant 0 : i32
    %c0_i32_0 = arith.constant 0 : i32
    %c0_i32_1 = arith.constant 0 : i32
    return %c0_i32, %c0_i32_0 : i32, i32
  }
  func.func @transform_2(%arg0: i32) -> (i32, i32) {
    %c0_i32 = arith.constant 0 : i32
    %c0_i32_0 = arith.constant 0 : i32
    %c0_i32_1 = arith.constant 0 : i32
    return %c0_i32, %c0_i32_0 : i32, i32
  }
  func.func @transform_3(%arg0: i32) -> (i32, i32) {
    %c0_i32 = arith.constant 0 : i32
    %c0_i32_0 = arith.constant 0 : i32
    %c0_i32_1 = arith.constant 0 : i32
    return %c0_i32, %c0_i32_0 : i32, i32
  }
  func.func @transform_4(%arg0: i32) -> (i32, i32) {
    %c0_i32 = arith.constant 0 : i32
    %c0_i32_0 = arith.constant 0 : i32
    %c0_i32_1 = arith.constant 0 : i32
    return %c0_i32, %c0_i32_0 : i32, i32
  }
  func.func @transform_5(%arg0: i32) -> (i32, i32) {
    %c0_i32 = arith.constant 0 : i32
    %c0_i32_0 = arith.constant 0 : i32
    return %arg0, %c0_i32 : i32, i32
  }
}

</mosaic_0001>

<bundles_post_ra>
// kernel: tpu_custom_call.1
= control target key start
LH: loop header
LB: loop body
LE: loop exit
PB: predicated region body
PF: predicated region fallthrough
CT: control target
= control target key end

     0   :  { %v270_v1 = vmov 0.0   ;;  %vm271_vm0 = vmmov 0   ;;  %s336_s0 = inlined_call_operand.vmem [shape: f32[8,32], index: 0, kind: input, shape index: {}]   ;;  %s337_s1 = inlined_call_operand.vmem [shape: f32[32,20], index: 1, kind: input, shape index: {}]   ;;  %s338_s2 = inlined_call_operand.vmem [shape: f32[1,20], index: 2, kind: input, shape index: {}]   ;;  %s339_s3 = inlined_call_operand.vmem [shape: f32[20,128], index: 3, kind: input, shape index: {}]   ;;  %s340_s4 = inlined_call_operand.vmem [shape: f32[1,128], index: 4, kind: input, shape index: {}]   ;;  %s341_s5 = inlined_call_operand.hbm [shape: f32[8,128], index: 5, kind: output, shape index: {}]  }
   0x1   :  { %v25_v0 = vld [vmem:[%s337_s1 + $0x18] sm:$0xff]  ;;  %225 = vmatprep.subr.mxu0 %v270_v1  ;;  %v24_v2 = vld [vmem:[%s337_s1 + $0x10] sm:$0xff]  ;;  %233 = vmatprep.mubr.msk.f32.mxu0 %vm271_vm0, %v270_v1 }
   0x2   :  { %226 = vmatpush3.msra.mxu0 %v25_v0  ;;  %236 = vmatprep.subr.mxu1 %v270_v1 }
   0x3   :  { %10 = vsyncpa [#allocation3], 0  ;;  %227 = vmatprep.subr.mxu0 %v270_v1  ;;  %v23_v3 = vld [vmem:[%s337_s1 + $0x8] sm:$0xff]  ;;  %242 = vmatprep.mubr.msk.f32.mxu1 %vm271_vm0, %v270_v1  ;;  %v22_v4 = vld [vmem:[%s337_s1] sm:$0xff]  ;;  %vm33_vm1 = vcmask 261120   ;;  %vm122_vm2 = vcmask 1043456  }
   0x4   :  { %228 = vmatpush3.msra.mxu0 %v24_v2  ;;  %v21_v5 = vld [vmem:[%s336_s0] sm:$0xff]  ;;  %v110_v6 = vld [vmem:[%s339_s3 + $0x10] sm:$0xf]  ;;  %v109_v7 = vld [vmem:[%s339_s3 + $0x8] sm:$0xff]  ;;  %vm118_vm3 = vcmask 162816   ;;  %s272_s11 = smov [#allocation2]  }
   0x5   :  { %229 = vmatprep.subr.mxu0 %v270_v1  ;;  %237 = vmatpush3.msk.msra.mxu1 %vm122_vm2, %v110_v6  ;;  %v108_v8 = vld [vmem:[%s339_s3] sm:$0xff]  ;;  %s203_s12 = sshll.u32 %s272_s11, 4  ;;  %s204_s12 = int_to_ptr.vmem [resolvable:$true] %s203_s12 }
   0x6   :  { %230 = vmatpush3.msra.mxu0 %v23_v3  ;;  %238 = vmatprep.subr.mxu1 %v270_v1  ;;  %v211_v9 = vld [vmem:[%s338_s2] ss:$0 sm:$0xff]  ;;  %s248_s3 = scalar_lea.vmem %s204_s12, 128  ;;  %p253_p1 = scmp.lt.s32.totalorder %s204_s12, %s204_s12 }
   0x7   :  { %231 = vmatprep.subr.mxu0 %v270_v1  ;;  %239 = vmatpush3.msra.mxu1 %v109_v7  ;;  %v213_v14 = vld [vmem:[%s340_s4] ss:$0 sm:$0xff]  ;;  %p249_p0 = scmp.ne.s32.totalorder %s204_s12, %s248_s3  ;;  %p254_p2 = scmp.lt.s32.totalorder %s248_s3, %s248_s3 }
   0x8   :  { %232 = vmatpush3.msra.mxu0 %v22_v4  ;;  %240 = vmatprep.subr.mxu1 %v270_v1 }
   0x9   :  { %234 = vmatmul.mubr.msk.f32.vlgmr.msra.gmra.mxu0 %vm33_vm1, %v21_v5  ;;  %241 = vmatpush3.msra.mxu1 %v108_v8  ;;  %p255_p3 = por %p254_p2, %p253_p1 }
   0xb   :  { %p256_p4 = pnand %p255_p3, %p249_p0 }
  0xc9   :  { %v103_v10 = vpop.f32.mrf.mxu0 }
  0xca   :  { %v104_v11 = vadd.f32 %v211_v9, %v103_v10 }
  0xcb   :  { %v235_v12 = vpop.f32.mrf.mxu0 }
  0xcc   :  { %v107_v13 = vmax.f32 %v104_v11, 0.0 }
  0xce   :  { %243 = vmatmul.mubr.msk.f32.vlgmr.msra.gmra.mxu1 %vm118_vm3, %v107_v13 }
 0x18e   :  { %v192_v15 = vpop.f32.mrf.mxu1 }
 0x18f   :  { %v193_v16 = vadd.f32 %v213_v14, %v192_v15 }
 0x190   :  { %v244_v17 = vpop.f32.mrf.mxu1 }
 0x191   :  { %196 = vst [vmem:[#allocation2] sm:$0xff] %v193_v16 }
 0x192   :  { %259 = shalt.err (!%p256_p4)
}
 0x193   :  { %206 = dma.vmem_to_hbm [thread:$0]  %s204_s12, 128, %s341_s5, [#allocation3]  }
 0x194   :  { %268 = dma.done.wait [#allocation3], 128  }
 0x195   :  { %269 = vsyncadd [#allocation3], 4294967168 }
 0x196   :  { %210 = vsyncpa [#allocation3], 1 }

</bundles_post_ra>
